<compile_context>
chip_gen: v7x
topology: tpu7x:2x2x1
jax: 0.10.0
libtpu: 0.0.40
codegen_flags: <defaults>
</compile_context>

<pallas_src>
import jax
import jax.numpy as jnp
from jax.experimental import pallas as pl
from jax.experimental.pallas import tpu as pltpu


def sigmanet_kernel(xt_ref, w1t_ref, b1t_ref, w2t_ref, b2t_ref, ot_ref):
    xt = xt_ref[...]                                                     # (D, TB)
    # Layer 1 (monotone residual units fused into W1/W2 by the wrapper).
    ht = jnp.dot(w1t_ref[...], xt, preferred_element_type=jnp.float32)  # (Ha, TB)  MXU
    ht = jnp.maximum(ht + b1t_ref[...], 0.0)                            # VPU
    # Layer 2 -> (O, TB); lane-dense over the batch.
    yt = jnp.dot(w2t_ref[...], ht.astype(w2t_ref.dtype),
                 preferred_element_type=jnp.float32)                    # (O, TB)   MXU
    ot_ref[...] = (yt + b2t_ref[...]).astype(ot_ref.dtype)              # full-width vst


def _round_up(n, m):
    return ((n + m - 1) // m) * m


def make_sigmanet_params(w1, b1, w2, b2, mask, sigma, *, use_bf16=False):
    """Build the transposed / augmented model constants ONCE (not per call).

    w1: (D, H); b1: (H,); w2: (H, O); b2: (O,); mask: (D,); sigma: scalar.
    The monotone residual s = x @ (sigma*mask) is folded into the MLP via two
    extra hidden units (+s, -s) and W2 rows (+1, -1): relu(s) - relu(-s) == s.
    """
    D, H = w1.shape
    O = w2.shape[1]
    sm = (jnp.float32(sigma) * mask.astype(jnp.float32)).reshape(D, 1)  # (D, 1)

    Ha = _round_up(H + 2, 8)  # +2 relu-pair units, padded to a sublane multiple
    w1_aug = jnp.zeros((D, Ha), jnp.float32)
    w1_aug = w1_aug.at[:, :H].set(w1.astype(jnp.float32))
    w1_aug = w1_aug.at[:, H:H + 1].set(sm)
    w1_aug = w1_aug.at[:, H + 1:H + 2].set(-sm)
    b1_aug = jnp.zeros((Ha,), jnp.float32).at[:H].set(b1.astype(jnp.float32))
    w2_aug = jnp.zeros((Ha, O), jnp.float32)
    w2_aug = w2_aug.at[:H, :].set(w2.astype(jnp.float32))
    w2_aug = w2_aug.at[H, :].set(1.0)
    w2_aug = w2_aug.at[H + 1, :].set(-1.0)

    mm_dtype = jnp.bfloat16 if use_bf16 else jnp.float32
    w1t = w1_aug.T.astype(mm_dtype)                 # (Ha, D)
    b1t = b1_aug.reshape(Ha, 1)                     # (Ha, 1) f32 (post-accumulate add)
    w2t = w2_aug.T.astype(mm_dtype)                 # (O, Ha)
    b2t = b2.reshape(O, 1).astype(jnp.float32)      # (O, 1)
    return w1t, b1t, w2t, b2t


def sigmanet_forward(x, params, *, tb_max=512):
    """x: (B, D). Returns (B, O)."""
    w1t, b1t, w2t, b2t = params
    B, D = x.shape
    Ha = w1t.shape[0]
    O = w2t.shape[0]
    mm_dtype = w1t.dtype

    # Lane tiling over the batch: fat tiles amortize the ~0.35us/step pipeline
    # overhead; keep >=2 tiles when B allows so v7x megacore has work per core.
    B128 = _round_up(B, 128)
    tb = min(tb_max, B128)
    if B128 >= 256 and B128 // tb < 2:
        tb = max(128, (B128 // 2) // 128 * 128)
    num_tiles = pl.cdiv(B128, tb)
    Bp = num_tiles * tb

    # Single pass over x establishes the transposed, lane-padded layout.
    # (Large-B callers can hold x pre-transposed as (D, B) and skip this.)
    if Bp == B:
        xt = x.T.astype(mm_dtype)
    else:
        xt = jnp.zeros((D, Bp), mm_dtype).at[:, :B].set(x.T.astype(mm_dtype))

    resident = lambda shape: pl.BlockSpec(shape, lambda i: (0, 0))  # weights stay put

    out_t = pl.pallas_call(
        sigmanet_kernel,
        out_shape=jax.ShapeDtypeStruct((O, Bp), jnp.float32),
        grid=(num_tiles,),
        in_specs=[
            pl.BlockSpec((D, tb), lambda i: (0, i)),   # xT: streamed lane tiles
            resident((Ha, D)),                         # W1ᵀ (monotone units fused)
            resident((Ha, 1)),                         # b1
            resident((O, Ha)),                         # W2ᵀ (+1/-1 residual rows)
            resident((O, 1)),                          # b2
        ],
        out_specs=pl.BlockSpec((O, tb), lambda i: (0, i)),  # lane-dense output
        compiler_params=pltpu.CompilerParams(
            dimension_semantics=("parallel",),          # megacore sharding on v7x
        ),
    )(xt, w1t, b1t, w2t, b2t)

    return out_t[:, :B].T                               # (B, O)


def sigmanet_reference(x, w1, b1, w2, b2, mask, sigma):
    h = jnp.maximum(x @ w1 + b1, 0.0)
    y = h @ w2 + b2
    return y + sigma * jnp.sum(x * mask, axis=-1, keepdims=True)


if __name__ == "__main__":
    key = jax.random.PRNGKey(0)
    B, D, H, O = 256, 4, 32, 1        # batch, in-features, hidden, out
    sigma = 0.5
    # monotone in the last feature only (as in the module's docstring example)
    monotone_constraints = jnp.array([0.0, 0.0, 0.0, 1.0], dtype=jnp.float32)

    kx, kw1, kb1, kw2, kb2 = jax.random.split(key, 5)
    x = jax.random.normal(kx, (B, D), dtype=jnp.float32)
    # deterministic synthetic "Lipschitz-constrained" weights
    w1 = jax.random.normal(kw1, (D, H), dtype=jnp.float32) * 0.1
    b1 = jax.random.normal(kb1, (H,), dtype=jnp.float32) * 0.01
    w2 = jax.random.normal(kw2, (H, O), dtype=jnp.float32) * 0.1
    b2 = jax.random.normal(kb2, (O,), dtype=jnp.float32) * 0.01

    # Model constants built once, outside the per-call path.
    params = make_sigmanet_params(w1, b1, w2, b2, monotone_constraints, sigma)

    out = sigmanet_forward(x, params)
    out = jax.block_until_ready(out)

    ref = sigmanet_reference(x, w1, b1, w2, b2, monotone_constraints, sigma)
    assert out.shape == (B, O)
    assert jnp.allclose(out, ref, atol=1e-5, rtol=1e-5), "mismatch vs reference"
    print("KERNEL_OK")
</pallas_src>

<mosaic_0001>
module attributes {stable_mosaic.version = 11 : i64} {
  func.func @sigmanet_kernel(%arg0: i32, %arg1: memref<4x128xf32, #tpu.memory_space<vmem>>, %arg2: memref<40x4xf32, #tpu.memory_space<vmem>>, %arg3: memref<40x1xf32, #tpu.memory_space<vmem>>, %arg4: memref<1x40xf32, #tpu.memory_space<vmem>>, %arg5: memref<1x1xf32, #tpu.memory_space<vmem>>, %arg6: memref<1x128xf32, #tpu.memory_space<vmem>>) attributes {dimension_semantics = [#tpu.dimension_semantics<parallel>], iteration_bounds = array<i64: 2>, scalar_prefetch = 0 : i64, scratch_operands = 0 : i64, tpu.core_type = #tpu.core_type<tc>, window_params = [{transform_indices = @transform_0, window_bounds = array<i64: 4, 128>}, {pipeline_mode = #tpu.pipeline_mode<synchronous>, transform_indices = @transform_1, window_bounds = array<i64: 40, 4>}, {pipeline_mode = #tpu.pipeline_mode<synchronous>, transform_indices = @transform_2, window_bounds = array<i64: 40, 1>}, {pipeline_mode = #tpu.pipeline_mode<synchronous>, transform_indices = @transform_3, window_bounds = array<i64: 1, 40>}, {pipeline_mode = #tpu.pipeline_mode<synchronous>, transform_indices = @transform_4, window_bounds = array<i64: 1, 1>}, {transform_indices = @transform_5, window_bounds = array<i64: 1, 128>}]} {
    %c0 = arith.constant 0 : index
    %c0_0 = arith.constant 0 : index
    %0 = vector.load %arg1[%c0, %c0_0] : memref<4x128xf32, #tpu.memory_space<vmem>>, vector<4x128xf32>
    %c0_1 = arith.constant 0 : index
    %c0_2 = arith.constant 0 : index
    %1 = vector.load %arg2[%c0_1, %c0_2] : memref<40x4xf32, #tpu.memory_space<vmem>>, vector<40x4xf32>
    %cst = arith.constant dense<0.000000e+00> : vector<40x128xf32>
    %2 = tpu.matmul %1, %0, %cst {dimension_numbers = #tpu.dot_dimension_numbers<[1], [0], [0], [1], [0, 0, 1, 1], [], []>} : vector<40x4xf32>, vector<4x128xf32>, vector<40x128xf32> -> vector<40x128xf32>
    %c0_3 = arith.constant 0 : index
    %c0_4 = arith.constant 0 : index
    %3 = vector.load %arg3[%c0_3, %c0_4] : memref<40x1xf32, #tpu.memory_space<vmem>>, vector<40x1xf32>
    %4 = vector.broadcast %3 : vector<40x1xf32> to vector<40x128xf32>
    %5 = arith.addf %2, %4 : vector<40x128xf32>
    %cst_5 = arith.constant 0.000000e+00 : f32
    %6 = vector.broadcast %cst_5 : f32 to vector<40x128xf32>
    %7 = arith.maximumf %5, %6 : vector<40x128xf32>
    %c0_6 = arith.constant 0 : index
    %c0_7 = arith.constant 0 : index
    %8 = vector.load %arg4[%c0_6, %c0_7] : memref<1x40xf32, #tpu.memory_space<vmem>>, vector<1x40xf32>
    %cst_8 = arith.constant dense<0.000000e+00> : vector<1x128xf32>
    %9 = tpu.matmul %8, %7, %cst_8 {dimension_numbers = #tpu.dot_dimension_numbers<[1], [0], [0], [1], [0, 0, 1, 1], [], []>} : vector<1x40xf32>, vector<40x128xf32>, vector<1x128xf32> -> vector<1x128xf32>
    %c0_9 = arith.constant 0 : index
    %c0_10 = arith.constant 0 : index
    %10 = vector.load %arg5[%c0_9, %c0_10] : memref<1x1xf32, #tpu.memory_space<vmem>>, vector<1x1xf32>
    %11 = vector.broadcast %10 : vector<1x1xf32> to vector<1x128xf32>
    %12 = arith.addf %9, %11 : vector<1x128xf32>
    %c0_11 = arith.constant 0 : index
    %c0_12 = arith.constant 0 : index
    %13 = vector.load %arg6[%c0_11, %c0_12] : memref<1x128xf32, #tpu.memory_space<vmem>>, vector<1x128xf32>
    tpu.vector_store %arg6[%c0_11, %c0_12], %12 {strides = array<i32>} : memref<1x128xf32, #tpu.memory_space<vmem>>, vector<1x128xf32>,
    return
  }
  func.func @transform_0(%arg0: i32) -> (i32, i32) {
    %c0_i32 = arith.constant 0 : i32
    %c0_i32_0 = arith.constant 0 : i32
    return %c0_i32, %arg0 : i32, i32
  }
  func.func @transform_1(%arg0: i32) -> (i32, i32) {
    %c0_i32 = arith.constant 0 : i32
    %c0_i32_0 = arith.constant 0 : i32
    %c0_i32_1 = arith.constant 0 : i32
    return %c0_i32, %c0_i32_0 : i32, i32
  }
  func.func @transform_2(%arg0: i32) -> (i32, i32) {
    %c0_i32 = arith.constant 0 : i32
    %c0_i32_0 = arith.constant 0 : i32
    %c0_i32_1 = arith.constant 0 : i32
    return %c0_i32, %c0_i32_0 : i32, i32
  }
  func.func @transform_3(%arg0: i32) -> (i32, i32) {
    %c0_i32 = arith.constant 0 : i32
    %c0_i32_0 = arith.constant 0 : i32
    %c0_i32_1 = arith.constant 0 : i32
    return %c0_i32, %c0_i32_0 : i32, i32
  }
  func.func @transform_4(%arg0: i32) -> (i32, i32) {
    %c0_i32 = arith.constant 0 : i32
    %c0_i32_0 = arith.constant 0 : i32
    %c0_i32_1 = arith.constant 0 : i32
    return %c0_i32, %c0_i32_0 : i32, i32
  }
  func.func @transform_5(%arg0: i32) -> (i32, i32) {
    %c0_i32 = arith.constant 0 : i32
    %c0_i32_0 = arith.constant 0 : i32
    return %c0_i32, %arg0 : i32, i32
  }
}

</mosaic_0001>

<bundles_post_ra>
// kernel: tpu_custom_call.1
= control target key start
LH: loop header
LB: loop body
LE: loop exit
PB: predicated region body
PF: predicated region fallthrough
CT: control target
= control target key end

     0   :  { %s888_s0 = inlined_call_operand.vmem [shape: f32[4,256], index: 0, kind: input, shape index: {}]   ;;  %s889_s1 = inlined_call_operand.vmem [shape: f32[40,4], index: 1, kind: input, shape index: {}]   ;;  %s890_s2 = inlined_call_operand.vmem [shape: f32[40,1], index: 2, kind: input, shape index: {}]   ;;  %s891_s3 = inlined_call_operand.vmem [shape: f32[1,40], index: 3, kind: input, shape index: {}]   ;;  %s892_s4 = inlined_call_operand.<no memory space> [shape: f32[1,1], index: 4, kind: input, shape index: {}]   ;;  %s893_s5 = inlined_call_operand.hbm [shape: f32[1,256], index: 5, kind: output, shape index: {}]  }
   0x1   :  { %v10_v0 = vstv %s892_s4 }
   0x2   :  { %11 = vst [vmem:[#allocation2] sm:$0x1] %v10_v0 }
   0x3   :  { %12 = vsyncpa [#allocation4], 0 }
   0x4   :  { %14 = vsyncpa [#allocation4 + $0x1], 0  ;;  %s736_s20 = smov 0   ;;  %s738_s21 = smov 0  }
   0x5   :  { %s740_s22 = smov 0   ;;  %s742_s23 = smov 0  }
   0x6 LB: > { %s757_s4 = sadd.s32 4294967295, %s696_s23   ;;  %s526_s24 = sadd.s32 4294967294, %s696_s23   ;;  %s696_s23 = sphi %s742_s23, %s899_s23   ;;  %s692_s22 = sphi %s740_s22, %s898_s22   ;;  %s688_s21 = sphi %s738_s21, %s897_s21   ;;  %s684_s20 = sphi %s736_s20, %s896_s20  }
   0x7   : > { %s761_s25 = sadd.s32 1, %s696_s23   ;;  %s137_s26 = sadd.s32 1, %s692_s22 }
   0x8   : > { %s134_s27 = ssub.s32 %s696_s23, %s761_s25  ;;  %p147_p0 = scmp.ne.s32.totalorder %s692_s22, %s688_s21 }
   0x9   : > { %p135_p1 = scmp.eq.s32.totalorder %s134_s27, 0  ;;  %p148_p2 = scmp.eq.s32.totalorder %s757_s4, 1 }
   0xa   : > { %p153_p3 = scmp.ne.s32.totalorder %s688_s21, %s684_s20  ;;  %p154_p4 = scmp.eq.s32.totalorder %s526_s24, 1 }
   0xb   : > { %s772_s28 = scalar_select %p135_p1, %s692_s22, %s137_s26  }
   0xc   : > { %p774_p5 = por %p148_p2, %p147_p0  ;;  %p778_p6 = por %p154_p4, %p153_p3 }
   0xd   : > { %p529_p7 = scmp.ge.s32.totalorder %s696_s23, 1  ;;  %p191_p8 = scmp.lt.s32.totalorder %s696_s23, 3 }
   0xf   : > { %p192_p9 = pnand %p529_p7, %p191_p8 }
  0x10   : > { %p217_p10 = scmp.lt.s32.totalorder (!%p192_p9), %s757_s4, 1  ;;  %v698_v1 = vmov (!%p192_p9), 0.0   ;;  %vm699_vm0 = vmmov (!%p192_p9), 0   ;;  %v700_v2 = vmov (!%p192_p9), 0   ;;  %v227_v3 = vld [vmem:[%s890_s2] sm:$0xff] (!%p192_p9)  ;;  %v229_v4 = vld [vmem:[%s890_s2 + $0x10] sm:$0xff] (!%p192_p9)  ;;  %v379_v44 = vlaneseq (!%p192_p9) }
  0x11   : > { %195 = sbr.rel (%p192_p9) target bundleno = 493 (0x1ed), region = 40  ;;  %553 = vmatprep.subr.mxu0 (!%p192_p9), %v698_v1  ;;  %555 = vmatprep.mubr.msk.f32.mxu0 (!%p192_p9), %vm699_vm0, %v698_v1  ;;  %vm273_vm1 = vcmask (!%p192_p9), 1043456   ;;  %v228_v5 = vld [vmem:[%s890_s2 + $0x8] sm:$0xff] (!%p192_p9)  ;;  %v222_v6 = vld [vmem:[%s889_s1] sm:$0xff] (!%p192_p9)  ;;  %vm257_vm2 = vcmask (!%p192_p9), 31744   ;;  %v230_v7 = vld [vmem:[%s890_s2 + $0x18] sm:$0xff] (!%p192_p9) }
  0x12   : > { %632 = vset.pattern.permute.xlu0 (!%p192_p9), %v700_v2  ;;  %633 = vset.pattern.permute.xlu1 (!%p192_p9), %v700_v2  ;;  %v231_v9 = vld [vmem:[%s890_s2 + $0x20] sm:$0xff] (!%p192_p9)  ;;  %v223_v10 = vld [vmem:[%s889_s1 + $0x8] sm:$0xff] (!%p192_p9)  ;;  %v224_v12 = vld [vmem:[%s889_s1 + $0x10] sm:$0xff] (!%p192_p9)  ;;  %v701_v15 = vmov (!%p192_p9), 0.0|0.0   ;;  %vm383_vm3 = vcmask (!%p192_p9), 326656   ;;  %v380_v45 = vshrl.u32 (!%p192_p9), %v379_v44, 7 }
  0x13   : > { %234 = vperm.xlu0 (!%p192_p9), %632, %v227_v3   ;;  %244 = vperm.xlu1 (!%p192_p9), %633, %v229_v4   ;;  %v373_v11 = vld [vmem:[#allocation2] sm:$0x1] (!%p192_p9)  ;;  %v225_v13 = vld [vmem:[%s889_s1 + $0x18] sm:$0xff] (!%p192_p9)  ;;  %s538_s17 = sshll.u32 (!%p192_p9), %s757_s4, 4 }
  0x14   : > { %580 = vmatprep.mubr.msk.f32.mxu1 (!%p192_p9), %vm699_vm0, %v698_v1  ;;  %v226_v14 = vld [vmem:[%s889_s1 + $0x20] sm:$0xff] (!%p192_p9)  ;;  %583 = vmatprep.subr.bf16.mxu1 (!%p192_p9), %v701_v15  ;;  %v381_v46 = vsub.s32 (!%p192_p9), 0, %v380_v45  ;;  %s846_s27 = scalar_lea.hbm (!%p192_p9), %s893_s5, %s538_s17 }
  0x15   : > { %v372_v43 = vld [vmem:[%s891_s3] sm:$0x1] (!%p192_p9) }
  0x17   : > { %239 = vperm.xlu0 (!%p192_p9), %632, %v228_v5   ;;  %249 = vperm.xlu1 (!%p192_p9), %633, %v230_v7  }
  0x18   : > { %s218_s6 = scalar_select %p217_p10, %s757_s4, 1 }
  0x19   : > { %s702_s4 = smov [#allocation3]  }
  0x1a   : > { %s530_s11 = sshll.u32 %s218_s6, 2  ;;  %s638_s8 = sshll.u32 %s702_s4, 4  ;;  %s639_s8 = int_to_ptr.vmem [resolvable:$false] %s638_s8 }
  0x1b   : > { %s220_s16 = scalar_lea.vmem %s888_s0, %s530_s11  ;;  %254 = vperm.xlu0 %632, %v231_v9   ;;  %376 = vperm.xlu1 %633, %v373_v11   ;;  %s640_s9 = scalar_lea.vmem %s639_s8, 32 }
  0x1c   : > { %v221_v8 = vld [vmem:[%s220_s16] sm:$0xf]  ;;  %s215_s16 = sand.u32 1, %s688_s21  }
  0x1d   : > { %554 = vmatpush3.msk.msra.mxu0 %vm273_vm1, %v221_v8  ;;  %s216_s18 = scalar_lea.vmem [#allocation3], %s215_s16  ;;  %s459_s6 = scalar_lea.sflag [#allocation4], %s215_s16 }
  0x1e   : > { %556 = vmatmul.mubr.msk.f32.vlgmr.msra.gmra.mrb[0].mxu0 %vm257_vm2, %v222_v6  ;;  %s471_s19 = sshll.u32 %s216_s18, 4  ;;  %s848_s19 = int_to_ptr.vmem [resolvable:$true] %s471_s19 }
  0x1f   : > { %558 = vmatprep.mubr.msk.f32.mxu0 %vm699_vm0, %v698_v1  ;;  %s634_s7 = scalar_lea.vmem %s848_s19, 16  ;;  %p641_p0 = scmp.lt.s32.totalorder %s848_s19, %s639_s8 }
  0x20   : > { %p635_p11 = scmp.ne.s32.totalorder %s848_s19, %s634_s7  ;;  %p642_p1 = scmp.lt.s32.totalorder %s640_s9, %s634_s7 }
  0x22   : > { %559 = vmatmul.mubr.msk.f32.gmra.mrb[2].mxu0 %vm257_vm2, %v223_v10  ;;  %p636_p12 = pnand %p635_p11, %p774_p5  ;;  %p643_p2 = por %p642_p1, %p641_p0 }
  0x23   : > { %561 = vmatprep.mubr.msk.f32.mxu0 %vm699_vm0, %v698_v1 }
  0x24   : > { %p637_p13 = pneg %p636_p12 }
  0x26   : > { %562 = vmatmul.mubr.msk.f32.gmra.mrb[4].mxu0 %vm257_vm2, %v224_v12  ;;  %p644_p3 = pnand %p643_p2, %p637_p13 }
  0x27   : > { %564 = vmatprep.mubr.msk.f32.mxu0 %vm699_vm0, %v698_v1 }
  0x2a   : > { %565 = vmatmul.mubr.msk.f32.gmra.mrb[6].mxu0 %vm257_vm2, %v225_v13 }
  0x2b   : > { %567 = vmatprep.mubr.msk.f32.mxu0 %vm699_vm0, %v698_v1 }
  0x2e   : > { %568 = vmatmul.mubr.msk.f32.gmra.mrb[8].mxu0 %vm257_vm2, %v226_v14 }
  0x92   : > { %v235_v16 = vpop.permute.xlu0 %234  ;;  %v245_v24 = vpop.permute.xlu1 %244 }
  0x96   : > { %v240_v20 = vpop.permute.xlu0 %239  ;;  %v250_v31 = vpop.permute.xlu1 %249 }
  0x9a   : > { %v255_v37 = vpop.permute.xlu0 %254  ;;  %v377_v47 = vpop.permute.xlu1 %376 }
  0x9b   : > { %v382_v48 = vrot.slane %v377_v47, %v381_v46 }
  0xf1   : > { %v343_v17 = vpop.f32.mrb[0].mxu0 }
  0xf2   : > { %v557_v18 = vpop.f32.mrb[1].mxu0  ;;  %v344_v19 = vadd.f32 %v343_v17, %v235_v16 }
  0xf4   : > { %v367_v25 = vmax.f32 %v344_v19, 0.0 }
  0xf5   : > { %v348_v21 = vpop.f32.mrb[2].mxu0 }
  0xf6   : > { %v349_v22 = vadd.f32 %v348_v21, %v240_v20  ;;  %v560_v23 = vpop.f32.mrb[3].mxu0 }
  0xf8   : > { %v368_v26 = vmax.f32 %v349_v22, 0.0 }
  0xf9   : > { %v353_v27 = vpop.f32.mrb[4].mxu0 }
  0xfa   : > { %v563_v28 = vpop.f32.mrb[5].mxu0  ;;  %v584_v29 = vpack.c.bf16 %v368_v26, %v367_v25  ;;  %v354_v30 = vadd.f32 %v353_v27, %v245_v24 }
  0xfc   : > { %585 = vmatpush3.bf16.msra.mxu1 %v584_v29  ;;  %v369_v35 = vmax.f32 %v354_v30, 0.0 }
  0xfd   : > { %v358_v32 = vpop.f32.mrb[6].mxu0  ;;  %586 = vmatprep.subr.bf16.mxu1 %v701_v15 }
  0xfe   : > { %v359_v33 = vadd.f32 %v358_v32, %v250_v31  ;;  %v566_v34 = vpop.f32.mrb[7].mxu0 }
 0x100   : > { %v370_v36 = vmax.f32 %v359_v33, 0.0 }
 0x101   : > { %v363_v38 = vpop.f32.mrb[8].mxu0 }
 0x102   : > { %v587_v39 = vpack.c.bf16 %v370_v36, %v369_v35  ;;  %v364_v40 = vadd.f32 %v363_v38, %v255_v37  ;;  %v569_v41 = vpop.f32.mrb[9].mxu0 }
 0x104   : > { %588 = vmatpush3.bf16.msra.mxu1 %v587_v39  ;;  %v371_v42 = vmax.f32 %v364_v40, 0.0 }
 0x105   : > { %578 = vmatprep.subr.mxu1 %v698_v1 }
 0x108   : > { %579 = vmatpush3.msra.mxu1 %v371_v42 }
 0x109   : > { %581 = vmatmul.mubr.msk.f32.vlgmr.msra.gmra.mrb[0].mxu1 %vm383_vm3, %v372_v43 }
 0x1dc   : > { %v453_v49 = vpop.f32.mrb[0].mxu1 }
 0x1dd   : > { %v454_v50 = vadd.f32 %v453_v49, %v382_v48  ;;  %v582_v51 = vpop.f32.mrb[1].mxu1 }
 0x1df   : > { %457 = vst [vmem:[%s216_s18] sm:$0x1] %v454_v50 }
 0x1e0   : > { %647 = shalt.err (!%p644_p3)
}
 0x1e1   : > { %s648_s10 = scalar_lea.hbm %s846_s27, 16  ;;  %s652_s13 = scalar_lea.hbm %s893_s5, 32 }
 0x1e2   : > { %p649_p4 = scmp.ne.s32.totalorder %s846_s27, %s648_s10  ;;  %p653_p9 = scmp.lt.u32.totalorder %s846_s27, %s893_s5 }
 0x1e3   : > { %p654_p10 = scmp.lt.u32.totalorder %s652_s13, %s648_s10  ;;  %p656_p12 = scmp.lt.u32.totalorder %s648_s10, %s846_s27 }
 0x1e4   : > { %p650_p7 = pnand %p649_p4, %p774_p5 }
 0x1e5   : > { %p655_p11 = por %p654_p10, %p653_p9 }
 0x1e6   : > { %p651_p8 = pneg %p650_p7 }
 0x1e7   : > { %p657_p13 = por %p656_p12, %p655_p11 }
 0x1e9   : > { %p658_p0 = pnand %p657_p13, %p651_p8 }
 0x1eb   : > { %661 = shalt.err (!%p658_p0)
}
 0x1ec   : > { %589 = dma.vmem_to_hbm [thread:$0]  (%p774_p5), %s848_s19, 16, %s846_s27, %s459_s6  }
 0x1ed PF: > { %p595_p1 = scmp.ge.s32.totalorder %s696_s23, 2  ;;  %s483_s16 = sand.u32 1, %s684_s20  }
 0x1ee   : > { %s484_s17 = scalar_lea.sflag [#allocation4], %s483_s16 }
 0x1ef   : > { %p592_p2 = pnand %p595_p1, %p778_p6 }
 0x1f1   : > { %679 = dma.done.wait (!%p592_p2), %s484_s17, 16  }
 0x1f2   : > { %681 = vsyncadd (!%p592_p2), %s484_s17, 4294967280  ;;  %p17_p3 = scmp.ge.s32.totalorder %s761_s25, 4   ;;  %s896_s20 = smov %s688_s21 }
 0x1f3   : > { %s897_s21 = smov %s692_s22  ;;  %s898_s22 = smov %s772_s28 }
 0x1f4   : > { %s899_s23 = smov %s761_s25  ;;  %19 = sbr.rel (!%p17_p3) target bundleno = 6 (0x6), region = 75 }
 0x1fb   :  { %488 = vsyncpa [#allocation4], 1 }
 0x1fc   :  { %490 = vsyncpa [#allocation4 + $0x1], 1 }

</bundles_post_ra>
